<compile_context>
chip_gen: v7x
topology: tpu7x:2x2x1
jax: 0.10.0
libtpu: 0.0.40
codegen_flags: <defaults>
</compile_context>

<pallas_src>
import jax
import jax.numpy as jnp
from jax.experimental import pallas as pl
from jax.experimental.pallas import tpu as pltpu


def _click_predictor_kernel(news_ref, user_ref, out_ref):
    # news_ref, user_ref: (TB, D) VMEM tiles; out_ref: (TB, 1) column.
    prod = news_ref[...] * user_ref[...]                               # VPU, native dtype
    row_dot = jnp.sum(prod, axis=-1, keepdims=True, dtype=jnp.float32)  # f32 accum, XLU lane reduce
    out_ref[...] = row_dot.astype(out_ref.dtype)


def _round_up(x: int, m: int) -> int:
    return (x + m - 1) // m * m


def _choose_block_rows(B: int, D: int, itemsize: int,
                       vmem_budget_bytes: int = 24 << 20,
                       max_rows: int = 8192) -> int:
    """Pick TB so pipelined VMEM buffers stay within budget (lane-padding aware)."""
    lanes = _round_up(D, 128)  # physical lane footprint of a (TB, D) block
    # 2 inputs x 2 pipeline buffers of (TB, lanes) + output x 2 buffers of (TB, 128 lanes).
    per_row = itemsize * (2 * 2 * lanes + 2 * 128)
    rows = vmem_budget_bytes // per_row
    rows = min(rows, max_rows)
    # Keep at least 2 grid steps so v7x's two TensorCores both get work
    # (and the DMA/compute pipeline has something to overlap).
    rows = min(rows, _round_up(pl.cdiv(B, 2), 8))
    rows = max(8, (rows // 8) * 8)
    return int(rows)


def _click_predictor_pallas(news_vector: jax.Array,
                            user_vector: jax.Array,
                            block_rows=None) -> jax.Array:
    B, D = news_vector.shape
    itemsize = news_vector.dtype.itemsize

    if B <= 8:
        TB = B  # block equals the full batch dim: always a legal single tile
    elif block_rows is None:
        TB = _choose_block_rows(B, D, itemsize)
    else:
        TB = max(8, (int(block_rows) // 8) * 8)
        TB = min(TB, _round_up(B, 8))

    num_tiles = pl.cdiv(B, TB)  # partial boundary block handled by the pipeline

    out = pl.pallas_call(
        _click_predictor_kernel,
        out_shape=jax.ShapeDtypeStruct((B, 1), news_vector.dtype),
        grid=(num_tiles,),
        in_specs=[pl.BlockSpec((TB, D), lambda i: (i, 0)),
                  pl.BlockSpec((TB, D), lambda i: (i, 0))],
        out_specs=pl.BlockSpec((TB, 1), lambda i: (i, 0)),
        compiler_params=pltpu.CompilerParams(
            dimension_semantics=("parallel",),   # v7x: shard batch tiles across both TCs
            vmem_limit_bytes=48 << 20,
        ),
        cost_estimate=pl.CostEstimate(
            flops=2 * B * D,
            transcendentals=0,
            bytes_accessed=(2 * B * D + B) * itemsize,
        ),
    )(news_vector, user_vector)

    # torch.bmm(...).flatten() -> (B,)
    return out[:, 0]


def click_predictor(news_vector: jax.Array,
                    user_vector: jax.Array,
                    *,
                    block_rows=None,
                    min_pallas_batch: int = 4096) -> jax.Array:
    """Batched dot product: returns shape (B,) like the PyTorch module."""
    assert news_vector.shape == user_vector.shape and news_vector.ndim == 2
    B, _ = news_vector.shape
    if B < min_pallas_batch:
        # Tiny batches: pallas_call dispatch overhead dwarfs the work and blocks
        # XLA fusion with adjacent ops; plain einsum is strictly better here.
        return jnp.einsum("bd,bd->b", user_vector, news_vector)
    return _click_predictor_pallas(news_vector, user_vector, block_rows)


if __name__ == "__main__":
    key = jax.random.PRNGKey(0)
    k1, k2, k3, k4 = jax.random.split(key, 4)

    # Case 1: small batch, D = 128, auto tile size (megacore cap forces 2 tiles).
    B1, D1 = 64, 128
    news1 = jax.random.normal(k1, (B1, D1), dtype=jnp.float32)
    user1 = jax.random.normal(k2, (B1, D1), dtype=jnp.float32)
    out1 = jax.block_until_ready(click_predictor(news1, user1, min_pallas_batch=0))
    ref1 = jnp.einsum("bd,bd->b", user1, news1)
    assert out1.shape == (B1,)
    assert jnp.allclose(out1, ref1, atol=1e-4, rtol=1e-4)

    # Case 2: ragged batch (300 % 128 != 0) with D not a multiple of 128:
    # exercises the partial boundary block with no input padding at all.
    B2, D2 = 300, 48
    news2 = jax.random.normal(k3, (B2, D2), dtype=jnp.float32)
    user2 = jax.random.normal(k4, (B2, D2), dtype=jnp.float32)
    out2 = jax.block_until_ready(
        click_predictor(news2, user2, block_rows=128, min_pallas_batch=0))
    ref2 = jnp.einsum("bd,bd->b", user2, news2)
    assert out2.shape == (B2,)
    assert jnp.allclose(out2, ref2, atol=1e-4, rtol=1e-4)

    print("KERNEL_OK")
</pallas_src>

<mosaic_0001>
module attributes {stable_mosaic.version = 11 : i64} {
  func.func @_click_predictor_kernel(%arg0: i32, %arg1: memref<32x128xf32, #tpu.memory_space<vmem>>, %arg2: memref<32x128xf32, #tpu.memory_space<vmem>>, %arg3: memref<32x1xf32, #tpu.memory_space<vmem>>) attributes {dimension_semantics = [#tpu.dimension_semantics<parallel>], iteration_bounds = array<i64: 2>, scalar_prefetch = 0 : i64, scratch_operands = 0 : i64, tpu.core_type = #tpu.core_type<tc>, window_params = [{transform_indices = @transform_0, window_bounds = array<i64: 32, 128>}, {transform_indices = @transform_1, window_bounds = array<i64: 32, 128>}, {transform_indices = @transform_2, window_bounds = array<i64: 32, 1>}]} {
    %c0 = arith.constant 0 : index
    %c0_0 = arith.constant 0 : index
    %0 = vector.load %arg1[%c0, %c0_0] : memref<32x128xf32, #tpu.memory_space<vmem>>, vector<32x128xf32>
    %c0_1 = arith.constant 0 : index
    %c0_2 = arith.constant 0 : index
    %1 = vector.load %arg2[%c0_1, %c0_2] : memref<32x128xf32, #tpu.memory_space<vmem>>, vector<32x128xf32>
    %2 = arith.mulf %0, %1 : vector<32x128xf32>
    %cst = arith.constant dense<0.000000e+00> : vector<32xf32>
    %3 = vector.multi_reduction <add>, %2, %cst [1] : vector<32x128xf32> to vector<32xf32>
    %4 = vector.shape_cast %3 : vector<32xf32> to vector<32x1xf32>
    %c0_3 = arith.constant 0 : index
    %c0_4 = arith.constant 0 : index
    %5 = vector.load %arg3[%c0_3, %c0_4] : memref<32x1xf32, #tpu.memory_space<vmem>>, vector<32x1xf32>
    tpu.vector_store %arg3[%c0_3, %c0_4], %4 {strides = array<i32>} : memref<32x1xf32, #tpu.memory_space<vmem>>, vector<32x1xf32>,
    return
  }
  func.func @transform_0(%arg0: i32) -> (i32, i32) {
    %c0_i32 = arith.constant 0 : i32
    %c0_i32_0 = arith.constant 0 : i32
    return %arg0, %c0_i32 : i32, i32
  }
  func.func @transform_1(%arg0: i32) -> (i32, i32) {
    %c0_i32 = arith.constant 0 : i32
    %c0_i32_0 = arith.constant 0 : i32
    return %arg0, %c0_i32 : i32, i32
  }
  func.func @transform_2(%arg0: i32) -> (i32, i32) {
    %c0_i32 = arith.constant 0 : i32
    %c0_i32_0 = arith.constant 0 : i32
    return %arg0, %c0_i32 : i32, i32
  }
}

</mosaic_0001>

<bundles_post_ra>
// kernel: tpu_custom_call.1
= control target key start
LH: loop header
LB: loop body
LE: loop exit
PB: predicated region body
PF: predicated region fallthrough
CT: control target
= control target key end

     0   :  { %7 = vsyncpa [#allocation3], 0  ;;  %s673_s0 = inlined_call_operand.hbm [shape: f32[64,128], index: 0, kind: input, shape index: {}]   ;;  %s674_s1 = inlined_call_operand.hbm [shape: f32[64,128], index: 1, kind: input, shape index: {}]   ;;  %s675_s2 = inlined_call_operand.vmem [shape: f32[64,1], index: 2, kind: output, shape index: {}]  }
   0x1   :  { %9 = vsyncpa [#allocation3 + $0x1], 0 }
   0x2   :  { %10 = vsyncpa [#allocation5], 0 }
   0x3   :  { %12 = vsyncpa [#allocation5 + $0x1], 0  ;;  %s506_s9 = smov 0   ;;  %s508_s10 = smov 0  }
   0x4   :  { %s510_s11 = smov 0   ;;  %s512_s12 = smov 0  }
   0x5 LB: > { %s322_s13 = sadd.s32 4294967295, %s485_s12   ;;  %s526_s14 = sadd.s32 1, %s485_s12   ;;  %s485_s12 = sphi %s512_s12, %s685_s12   ;;  %s481_s11 = sphi %s510_s11, %s684_s11   ;;  %s477_s10 = sphi %s508_s10, %s683_s10   ;;  %s473_s9 = sphi %s506_s9, %s682_s9  }
   0x6   : > { %s22_s15 = ssub.s32 %s485_s12, %s526_s14  ;;  %s25_s16 = sadd.s32 1, %s481_s11 }
   0x7   : > { %p23_p0 = scmp.eq.s32.totalorder %s22_s15, 0  ;;  %p32_p1 = scmp.ne.s32.totalorder %s481_s11, %s477_s10 }
   0x8   : > { %p33_p2 = scmp.eq.s32.totalorder %s485_s12, 0  ;;  %p38_p3 = scmp.ne.s32.totalorder %s477_s10, %s473_s9 }
   0x9   : > { %s536_s17 = scalar_select %p23_p0, %s481_s11, %s25_s16  }
   0xa   : > { %p34_p4 = por %p33_p2, %p32_p1  ;;  %p39_p5 = scmp.eq.s32.totalorder %s322_s13, 0 }
   0xb   : > { %p352_p6 = scmp.lt.s32.totalorder %s485_s12, 2  ;;  %s546_s19 = sand.u32 1, %s481_s11  }
   0xc   : > { %p541_p7 = por %p39_p5, %p38_p3  ;;  %s326_s20 = sshll.u32 %s546_s19, 5 }
   0xd   : > { %s339_s21 = sshll.u32 %s485_s12, 9  ;;  %s118_s25 = scalar_lea.vmem [#allocation2], %s326_s20 }
   0xe   : > { %s677_s18 = scalar_select %p541_p7, 1, 0 }
   0xf   : > { %s555_s24 = scalar_lea.hbm %s673_s0, %s339_s21  ;;  %s125_s26 = sshll.u32 %s118_s25, 4  ;;  %s559_s26 = int_to_ptr.vmem [resolvable:$true] %s125_s26 }
  0x10   : > { %p561_p8 = pnand %p352_p6, %p34_p4  ;;  %s115_s28 = scalar_lea.sflag [#allocation3], %s546_s19 }
  0x11   : > { %s387_s29 = scalar_lea.hbm %s555_s24, 512  ;;  %s392_s4 = scalar_lea.hbm %s673_s0, 1024 }
  0x12   : > { %p388_p10 = scmp.ne.s32.totalorder %s555_s24, %s387_s29  ;;  %p389_p11 = pneg %p561_p8 }
  0x13   : > { %p393_p0 = scmp.lt.u32.totalorder %s555_s24, %s673_s0  ;;  %p394_p1 = scmp.lt.u32.totalorder %s392_s4, %s387_s29 }
  0x14   : > { %p390_p12 = pnand %p389_p11, %p388_p10  ;;  %p396_p3 = scmp.lt.u32.totalorder %s387_s29, %s555_s24 }
  0x15   : > { %p395_p2 = por %p394_p1, %p393_p0 }
  0x16   : > { %p391_p13 = pneg %p390_p12 }
  0x17   : > { %p397_p4 = por %p396_p3, %p395_p2 }
  0x19   : > { %p398_p5 = pnand %p397_p4, %p391_p13 }
  0x1b   : > { %401 = shalt.err (!%p398_p5)
}
  0x1c   : > { %s402_s7 = scalar_lea.vmem %s559_s26, 512  ;;  %s487_s8 = smov [#allocation2]  }
  0x1d   : > { %p403_p6 = scmp.ne.s32.totalorder %s559_s26, %s402_s7  ;;  %s407_s9 = sshll.u32 %s487_s8, 4  ;;  %s408_s9 = int_to_ptr.vmem [resolvable:$false] %s407_s9 }
  0x1e   : > { %s409_s15 = scalar_lea.vmem %s408_s9, 1024  ;;  %p410_p9 = scmp.lt.s32.totalorder %s559_s26, %s408_s9 }
  0x1f   : > { %p405_p10 = pnand %p403_p6, %p389_p11  ;;  %p411_p0 = scmp.lt.s32.totalorder %s409_s15, %s402_s7 }
  0x21   : > { %p406_p12 = pneg %p405_p10  ;;  %p412_p1 = por %p411_p0, %p410_p9 }
  0x23   : > { %p413_p2 = pnand %p412_p1, %p406_p12 }
  0x25   : > { %416 = shalt.err (!%p413_p2)
}
  0x26   : > { %s488_s16 = smov 128   ;;  %s489_s22 = smov 8  }
  0x27   : > { %348 = dma.hbm_to_vmem [thread:$0]  (!%p561_p8), %s555_s24, 512, %s559_s26, %s115_s28, %s488_s16, %s488_s16, %s489_s22  }
  0x28   : > { %p154_p9 = scmp.lt.s32.totalorder %s485_s12, 3  ;;  %s603_s29 = scalar_lea.hbm %s674_s1, %s339_s21 }
  0x29   : > { %p679_p13 = scmp.ge.s32.totalorder %s485_s12, 1  ;;  %s139_s3 = scalar_lea.vmem [#allocation4], %s326_s20 }
  0x2a   : > { %s146_s4 = sshll.u32 %s139_s3, 4  ;;  %s136_s24 = scalar_lea.sflag [#allocation5], %s546_s19  ;;  %s613_s4 = int_to_ptr.vmem [resolvable:$true] %s146_s4 }
  0x2b   : > { %p607_p3 = pnand %p679_p13, %p154_p9  ;;  %s417_s26 = scalar_lea.hbm %s603_s29, 512 }
  0x2c   : > { %p418_p4 = scmp.ne.s32.totalorder %s603_s29, %s417_s26  ;;  %s422_s5 = scalar_lea.hbm %s674_s1, 1024 }
  0x2d   : > { %p423_p10 = scmp.lt.u32.totalorder %s603_s29, %s674_s1  ;;  %p424_p12 = scmp.lt.u32.totalorder %s422_s5, %s417_s26 }
  0x2e   : > { %p420_p5 = pnand %p418_p4, %p389_p11  ;;  %p426_p1 = scmp.lt.u32.totalorder %s417_s26, %s603_s29 }
  0x2f   : > { %p425_p0 = por %p424_p12, %p423_p10 }
  0x30   : > { %p421_p6 = pneg %p420_p5 }
  0x31   : > { %p427_p2 = por %p426_p1, %p425_p0 }
  0x33   : > { %p428_p9 = pnand %p427_p2, %p421_p6 }
  0x35   : > { %431 = shalt.err (!%p428_p9)
}
  0x36   : > { %s432_s20 = scalar_lea.vmem %s613_s4, 512  ;;  %s490_s8 = smov [#allocation4]  }
  0x37   : > { %p433_p13 = scmp.ne.s32.totalorder %s613_s4, %s432_s20  ;;  %s437_s9 = sshll.u32 %s490_s8, 4  ;;  %s438_s9 = int_to_ptr.vmem [resolvable:$false] %s437_s9 }
  0x38   : > { %s439_s15 = scalar_lea.vmem %s438_s9, 1024  ;;  %p440_p7 = scmp.lt.s32.totalorder %s613_s4, %s438_s9 }
  0x39   : > { %p435_p4 = pnand %p433_p13, %p389_p11  ;;  %p441_p10 = scmp.lt.s32.totalorder %s439_s15, %s432_s20 }
  0x3b   : > { %p436_p5 = pneg %p435_p4  ;;  %p442_p12 = por %p441_p10, %p440_p7 }
  0x3d   : > { %p443_p0 = pnand %p442_p12, %p436_p5 }
  0x3f   : > { %446 = shalt.err (!%p443_p0)
}
  0x40   : > { %351 = dma.hbm_to_vmem [thread:$0]  (!%p561_p8), %s603_s29, 512, %s613_s4, %s136_s24, %s488_s16, %s488_s16, %s489_s22  }
  0x41   : > { %158 = sbr.rel (%p607_p3) target bundleno = 226 (0xe2), region = 28  ;;  %s160_s23 = sand.u32 (!%p607_p3), 1, %s477_s10  }
  0x42   : > { %s333_s25 = sshll.u32 (!%p607_p3), %s160_s23, 5  ;;  %s161_s3 = scalar_lea.sflag (!%p607_p3), [#allocation3], %s160_s23 }
  0x43   : > { %s164_s26 = scalar_lea.vmem (!%p607_p3), [#allocation2], %s333_s25  ;;  %p681_p7 = scmp.ne.s32.totalorder (!%p607_p3), %s677_s18, 0 }
  0x48   : > { %464 = dma.done.wait (%p681_p7), %s161_s3, 512  }
  0x49   : > { %466 = vsyncadd (%p681_p7), %s161_s3, 4294966784  ;;  %s170_s27 = scalar_lea.sflag [#allocation5], %s160_s23  ;;  %s173_s19 = scalar_lea.vmem [#allocation4], %s333_s25 }
  0x4a   : > { %468 = dma.done.wait (%p681_p7), %s170_s27, 512  }
  0x4b   : > { %470 = vsyncadd (%p681_p7), %s170_s27, 4294966784  ;;  %v207_v0 = vld [vmem:[%s164_s26] sm:$0xff]  ;;  %v209_v2 = vld [vmem:[%s164_s26 + $0x10] sm:$0xff]  ;;  %s335_s18 = sshll.u32 %s322_s13, 2  ;;  %vm227_vm0 = vcmask 7168  }
  0x4c   : > { %v211_v1 = vld [vmem:[%s173_s19] sm:$0xff]  ;;  %v213_v4 = vld [vmem:[%s173_s19 + $0x10] sm:$0xff]  ;;  %v208_v5 = vld [vmem:[%s164_s26 + $0x8] sm:$0xff]  ;;  %p202_p8 = scmp.lt.s32.totalorder %s335_s18, 7 }
  0x4d   : > { %v215_v3 = vmul.f32 %v211_v1, %v207_v0  ;;  %v212_v6 = vld [vmem:[%s173_s19 + $0x8] sm:$0xff]  ;;  %v217_v7 = vmul.f32 %v213_v4, %v209_v2  ;;  %v210_v8 = vld [vmem:[%s164_s26 + $0x18] sm:$0xff] }
  0x4e   : > { %v214_v9 = vld [vmem:[%s173_s19 + $0x18] sm:$0xff]  ;;  %v216_v10 = vmul.f32 %v212_v6, %v208_v5  ;;  %s687_s18 = smov (!%p202_p8, %s335_s18), 7 }
  0x4f   : > { %219 = vadd.xlane.f32.xlu0 %v215_v3  ;;  %223 = vadd.xlane.f32.xlu1 %v217_v7  ;;  %v218_v11 = vmul.f32 %v214_v9, %v210_v8  ;;  %s336_s16 = sshll.u32 %s687_s18, 3 }
  0x50   : > { %s205_s30 = scalar_lea.vmem %s675_s2, %s336_s16 }
  0x53   : > { %221 = vadd.xlane.f32.xlu0 %v216_v10  ;;  %225 = vadd.xlane.f32.xlu1 %v218_v11 }
  0xdc   : > { %v220_v12 = vpop.xlane.xlu0 %219  ;;  %v224_v13 = vpop.xlane.xlu1 %223 }
  0xdd   : > { %228 = vst.msk [vmem:[%s205_s30] sm:$0xff] %vm227_vm0, %v220_v12  ;;  %230 = vst.msk [vmem:[%s205_s30 + $0x10] sm:$0xff] %vm227_vm0, %v224_v13 }
  0xe0   : > { %v222_v14 = vpop.xlane.xlu0 %221  ;;  %v226_v15 = vpop.xlane.xlu1 %225 }
  0xe1   : > { %229 = vst.msk [vmem:[%s205_s30 + $0x8] sm:$0xff] %vm227_vm0, %v222_v14  ;;  %231 = vst.msk [vmem:[%s205_s30 + $0x18] sm:$0xff] %vm227_vm0, %v226_v15 }
  0xe2 PF: > { %p15_p11 = scmp.ge.s32.totalorder %s526_s14, 4   ;;  %s682_s9 = smov %s477_s10 }
  0xe3   : > { %s683_s10 = smov %s481_s11  ;;  %s684_s11 = smov %s536_s17 }
  0xe4   : > { %s685_s12 = smov %s526_s14  ;;  %17 = sbr.rel (!%p15_p11) target bundleno = 5 (0x5), region = 81 }
  0xeb   :  { %254 = vsyncpa [#allocation3], 1 }
  0xec   :  { %256 = vsyncpa [#allocation3 + $0x1], 1 }
  0xed   :  { %257 = vsyncpa [#allocation5], 1 }
  0xee   :  { %259 = vsyncpa [#allocation5 + $0x1], 1 }

</bundles_post_ra>
